<compile_context>
chip_gen: v7x
topology: tpu7x:2x2x1
jax: 0.10.0
libtpu: 0.0.40
codegen_flags: <defaults>
</compile_context>

<pallas_src>
import jax
import jax.numpy as jnp
from jax import lax
from jax.experimental import pallas as pl
from jax.experimental.pallas import tpu as pltpu

BN_EPS = 1e-5


def _round_up(x, m):
    return ((x + m - 1) // m) * m


def _vmem_capacity_bytes():
    try:
        return int(pltpu.get_tpu_info().vmem_capacity_bytes)
    except Exception:
        return 64 * 1024 * 1024  # conservative (v7x-sized) fallback


def _pick_hw_tile(hw, c_in, c_out, x_bytes, budget_bytes):
    """Largest lane-dense (multiple-of-128) pixel tile whose double-buffered
    footprint fits the per-generation VMEM budget."""
    hw128 = _round_up(hw, 128)
    # Per-pixel bytes for the heavier (write) pass:
    #   x tile   : 2 buffers * Cin  * x_bytes
    #   out tile : 2 buffers * Cout * x_bytes
    #   f32 matmul intermediate (conservative): 2 * Cout * 4
    per_pixel = 2 * c_in * x_bytes + 2 * c_out * x_bytes + 2 * c_out * 4
    max_pixels = max(budget_bytes // per_pixel, 128)
    tile = min(hw128, (max_pixels // 128) * 128)
    tile = max(tile, 128)
    hw_padded = _round_up(hw, tile)
    return tile, hw_padded


def _stats_kernel(x_ref, s_ref, g_ref):
    # x_ref: (Cin, TILE) native dtype
    # s_ref: (Cin, 1)    f32 per-batch channel sums (resident over tile axis)
    # g_ref: (Cin, Cin)  f32 per-batch Gram matrix  (resident over tile axis)
    @pl.when(pl.program_id(1) == 0)
    def _init():
        s_ref[...] = jnp.zeros_like(s_ref)
        g_ref[...] = jnp.zeros_like(g_ref)

    x = x_ref[...]
    ones = jnp.ones((x.shape[1], 1), dtype=x.dtype)
    # Both reductions over pixels ride the MXU contraction; accumulation in f32.
    s_ref[...] += jnp.dot(x, ones, preferred_element_type=jnp.float32)
    g_ref[...] += lax.dot_general(
        x, x, (((1,), (1,)), ((), ())), preferred_element_type=jnp.float32)


def _apply_kernel(x_ref, w_ref, shift_ref, o_ref):
    # o = W' @ x + shift, where W' already carries the folded BN scale.
    y = jnp.dot(w_ref[...], x_ref[...], preferred_element_type=jnp.float32)
    o_ref[...] = (y + shift_ref[...]).astype(o_ref.dtype)


def mapping_forward(x_nchw, conv_w, gamma, beta):
    """x_nchw: (N, Cin, H, W); conv_w: (Cout, Cin, 1, 1); gamma/beta: (Cout,)"""
    n, c_in, h, w_sp = x_nchw.shape
    c_out = conv_w.shape[0]
    hw = h * w_sp
    x_bytes = jnp.dtype(x_nchw.dtype).itemsize

    vmem_cap = _vmem_capacity_bytes()
    tile_budget = vmem_cap // 2           # headroom for buffering/intermediates
    vmem_limit = int(vmem_cap * 3 // 4)

    hw_tile, hw_padded = _pick_hw_tile(hw, c_in, c_out, x_bytes, tile_budget)
    n_tiles = hw_padded // hw_tile

    # Free reshape; zero-pad H*W so all tiles are lane-dense (zeros contribute
    # nothing to s or G, and padded output columns are sliced away at the end).
    x3 = x_nchw.reshape(n, c_in, hw)
    if hw_padded != hw:
        x3 = jnp.pad(x3, ((0, 0), (0, 0), (0, hw_padded - hw)))

    w_mat = conv_w.reshape(c_out, c_in)

    grid = (n, n_tiles)
    x_spec = pl.BlockSpec((None, c_in, hw_tile), lambda i, t: (i, 0, t))

    # ---- pass 1: per-batch channel sums + Gram matrix of x (pure streaming) --
    s_spec = pl.BlockSpec((None, c_in, 1), lambda i, t: (i, 0, 0))
    g_spec = pl.BlockSpec((None, c_in, c_in), lambda i, t: (i, 0, 0))
    s_nb, g_nb = pl.pallas_call(
        _stats_kernel,
        out_shape=(jax.ShapeDtypeStruct((n, c_in, 1), jnp.float32),
                   jax.ShapeDtypeStruct((n, c_in, c_in), jnp.float32)),
        grid=grid,
        in_specs=[x_spec],
        out_specs=(s_spec, g_spec),
        compiler_params=pltpu.CompilerParams(
            dimension_semantics=("parallel", "arbitrary"),
            vmem_limit_bytes=vmem_limit,
        ),
    )(x3)

    # ---- BN epilogue hoisted out of the kernels (tiny, plain JAX) ------------
    inv_m = 1.0 / float(n * hw)                   # true pixel count (pad-free)
    s_tot = jnp.sum(s_nb, axis=0)                 # (Cin, 1)
    g_tot = jnp.sum(g_nb, axis=0)                 # (Cin, Cin)
    w32 = w_mat.astype(jnp.float32)
    sum_y = w32 @ s_tot                           # (Cout, 1)
    sumsq_y = jnp.sum((w32 @ g_tot) * w32, axis=1, keepdims=True)  # (Cout, 1)
    mean = sum_y * inv_m
    var = jnp.maximum(sumsq_y * inv_m - mean * mean, 0.0)  # guard cancellation
    scale = gamma.reshape(c_out, 1).astype(jnp.float32) * lax.rsqrt(var + BN_EPS)
    shift = beta.reshape(c_out, 1).astype(jnp.float32) - mean * scale
    w_fold = (scale * w32).astype(x_nchw.dtype)   # fold BN scale into the conv

    # ---- pass 2: out = W' @ x + shift, fully tile-parallel -------------------
    w_spec = pl.BlockSpec((c_out, c_in), lambda i, t: (0, 0))
    shift_spec = pl.BlockSpec((c_out, 1), lambda i, t: (0, 0))
    o_spec = pl.BlockSpec((None, c_out, hw_tile), lambda i, t: (i, 0, t))
    out3 = pl.pallas_call(
        _apply_kernel,
        out_shape=jax.ShapeDtypeStruct((n, c_out, hw_padded), x_nchw.dtype),
        grid=grid,
        in_specs=[x_spec, w_spec, shift_spec],
        out_specs=o_spec,
        compiler_params=pltpu.CompilerParams(
            dimension_semantics=("parallel", "parallel"),
            vmem_limit_bytes=vmem_limit,
        ),
    )(x3, w_fold, shift)

    if hw_padded != hw:
        out3 = out3[:, :, :hw]
    return out3.reshape(n, c_out, h, w_sp)


def _reference(x_nchw, conv_w, gamma, beta):
    """Pure-JAX reference (PyTorch Mapping.forward in training mode)."""
    c_out, c_in = conv_w.shape[0], conv_w.shape[1]
    y = jnp.einsum("nchw,oc->nohw", x_nchw, conv_w.reshape(c_out, c_in))
    mean = jnp.mean(y, axis=(0, 2, 3), keepdims=True)
    var = jnp.mean((y - mean) ** 2, axis=(0, 2, 3), keepdims=True)
    return (y - mean) / jnp.sqrt(var + BN_EPS) * gamma.reshape(1, -1, 1, 1) \
        + beta.reshape(1, -1, 1, 1)


# TODO(synk): running_mean / running_var updates of BatchNorm2d are training
# side-effects and are not needed for the forward output; not implemented.

if __name__ == "__main__":
    key = jax.random.PRNGKey(0)
    k_x, k_w = jax.random.split(key)

    N, C_IN, C_OUT, H, W = 2, 4, 8, 16, 16

    x = jax.random.normal(k_x, (N, C_IN, H, W), dtype=jnp.float32)
    conv_w = jax.random.normal(k_w, (C_OUT, C_IN, 1, 1), dtype=jnp.float32) * 0.1
    gamma = jnp.ones((C_OUT,), dtype=jnp.float32)   # BatchNorm2d default affine
    beta = jnp.zeros((C_OUT,), dtype=jnp.float32)

    fwd = jax.jit(mapping_forward)
    out = jax.block_until_ready(fwd(x, conv_w, gamma, beta))

    ref = jax.block_until_ready(_reference(x, conv_w, gamma, beta))
    assert out.shape == (N, C_OUT, H, W)
    assert jnp.max(jnp.abs(out - ref)) < 1e-4

    print("KERNEL_OK")
</pallas_src>

<mosaic_0001>
module attributes {stable_mosaic.version = 11 : i64} {
  func.func @_stats_kernel(%arg0: i32, %arg1: i32, %arg2: memref<1x4x256xf32, #tpu.memory_space<vmem>>, %arg3: memref<1x4x1xf32, #tpu.memory_space<vmem>>, %arg4: memref<1x4x4xf32, #tpu.memory_space<vmem>>) attributes {dimension_semantics = [#tpu.dimension_semantics<parallel>, #tpu.dimension_semantics<arbitrary>], iteration_bounds = array<i64: 2, 1>, scalar_prefetch = 0 : i64, scratch_operands = 0 : i64, tpu.core_type = #tpu.core_type<tc>, window_params = [{transform_indices = @transform_0, window_bounds = array<i64: 1, 4, 256>}, {transform_indices = @transform_1, window_bounds = array<i64: 1, 4, 1>}, {transform_indices = @transform_2, window_bounds = array<i64: 1, 4, 4>}]} {
    %c0_i32 = arith.constant 0 : i32
    %0 = arith.cmpi eq, %arg1, %c0_i32 : i32
    %1 = arith.extui %0 : i1 to i32
    %c0_i32_0 = arith.constant 0 : i32
    %2 = arith.cmpi ne, %1, %c0_i32_0 : i32
    scf.if %2 {
      %cst_17 = arith.constant 0.000000e+00 : f32
      %20 = vector.broadcast %cst_17 : f32 to vector<4x1xf32>
      %c0_18 = arith.constant 0 : index
      %c0_19 = arith.constant 0 : index
      %c0_20 = arith.constant 0 : index
      %21 = vector.load %arg3[%c0_18, %c0_19, %c0_20] : memref<1x4x1xf32, #tpu.memory_space<vmem>>, vector<1x4x1xf32>
      %22 = vector.shape_cast %21 : vector<1x4x1xf32> to vector<4x1xf32>
      %23 = vector.shape_cast %20 : vector<4x1xf32> to vector<1x4x1xf32>
      tpu.vector_store %arg3[%c0_18, %c0_19, %c0_20], %23 {strides = array<i32>} : memref<1x4x1xf32, #tpu.memory_space<vmem>>, vector<1x4x1xf32>,
      %cst_21 = arith.constant 0.000000e+00 : f32
      %24 = vector.broadcast %cst_21 : f32 to vector<4x4xf32>
      %c0_22 = arith.constant 0 : index
      %c0_23 = arith.constant 0 : index
      %c0_24 = arith.constant 0 : index
      %25 = vector.load %arg4[%c0_22, %c0_23, %c0_24] : memref<1x4x4xf32, #tpu.memory_space<vmem>>, vector<1x4x4xf32>
      %26 = vector.shape_cast %25 : vector<1x4x4xf32> to vector<4x4xf32>
      %27 = vector.shape_cast %24 : vector<4x4xf32> to vector<1x4x4xf32>
      tpu.vector_store %arg4[%c0_22, %c0_23, %c0_24], %27 {strides = array<i32>} : memref<1x4x4xf32, #tpu.memory_space<vmem>>, vector<1x4x4xf32>,
    } else {
    }
    %c0 = arith.constant 0 : index
    %c0_1 = arith.constant 0 : index
    %c0_2 = arith.constant 0 : index
    %3 = vector.load %arg2[%c0, %c0_1, %c0_2] : memref<1x4x256xf32, #tpu.memory_space<vmem>>, vector<1x4x256xf32>
    %4 = vector.shape_cast %3 : vector<1x4x256xf32> to vector<4x256xf32>
    %cst = arith.constant 1.000000e+00 : f32
    %5 = vector.broadcast %cst : f32 to vector<256x1xf32>
    %c0_3 = arith.constant 0 : index
    %c0_4 = arith.constant 0 : index
    %c0_5 = arith.constant 0 : index
    %6 = vector.load %arg3[%c0_3, %c0_4, %c0_5] : memref<1x4x1xf32, #tpu.memory_space<vmem>>, vector<1x4x1xf32>
    %7 = vector.shape_cast %6 : vector<1x4x1xf32> to vector<4x1xf32>
    %cst_6 = arith.constant dense<0.000000e+00> : vector<4x1xf32>
    %8 = tpu.matmul %4, %5, %cst_6 {dimension_numbers = #tpu.dot_dimension_numbers<[1], [0], [0], [1], [0, 0, 1, 1], [], []>} : vector<4x256xf32>, vector<256x1xf32>, vector<4x1xf32> -> vector<4x1xf32>
    %9 = arith.addf %7, %8 : vector<4x1xf32>
    %c0_7 = arith.constant 0 : index
    %c0_8 = arith.constant 0 : index
    %c0_9 = arith.constant 0 : index
    %10 = vector.load %arg3[%c0_7, %c0_8, %c0_9] : memref<1x4x1xf32, #tpu.memory_space<vmem>>, vector<1x4x1xf32>
    %11 = vector.shape_cast %10 : vector<1x4x1xf32> to vector<4x1xf32>
    %12 = vector.shape_cast %9 : vector<4x1xf32> to vector<1x4x1xf32>
    tpu.vector_store %arg3[%c0_7, %c0_8, %c0_9], %12 {strides = array<i32>} : memref<1x4x1xf32, #tpu.memory_space<vmem>>, vector<1x4x1xf32>,
    %c0_10 = arith.constant 0 : index
    %c0_11 = arith.constant 0 : index
    %c0_12 = arith.constant 0 : index
    %13 = vector.load %arg4[%c0_10, %c0_11, %c0_12] : memref<1x4x4xf32, #tpu.memory_space<vmem>>, vector<1x4x4xf32>
    %14 = vector.shape_cast %13 : vector<1x4x4xf32> to vector<4x4xf32>
    %cst_13 = arith.constant dense<0.000000e+00> : vector<4x4xf32>
    %15 = tpu.matmul %4, %4, %cst_13 {dimension_numbers = #tpu.dot_dimension_numbers<[1], [1], [0], [0], [0, 0, 1, 0], [], []>} : vector<4x256xf32>, vector<4x256xf32>, vector<4x4xf32> -> vector<4x4xf32>
    %16 = arith.addf %14, %15 : vector<4x4xf32>
    %c0_14 = arith.constant 0 : index
    %c0_15 = arith.constant 0 : index
    %c0_16 = arith.constant 0 : index
    %17 = vector.load %arg4[%c0_14, %c0_15, %c0_16] : memref<1x4x4xf32, #tpu.memory_space<vmem>>, vector<1x4x4xf32>
    %18 = vector.shape_cast %17 : vector<1x4x4xf32> to vector<4x4xf32>
    %19 = vector.shape_cast %16 : vector<4x4xf32> to vector<1x4x4xf32>
    tpu.vector_store %arg4[%c0_14, %c0_15, %c0_16], %19 {strides = array<i32>} : memref<1x4x4xf32, #tpu.memory_space<vmem>>, vector<1x4x4xf32>,
    return
  }
  func.func @transform_0(%arg0: i32, %arg1: i32) -> (i32, i32, i32) {
    %c0_i32 = arith.constant 0 : i32
    %c0_i32_0 = arith.constant 0 : i32
    return %arg0, %c0_i32, %arg1 : i32, i32, i32
  }
  func.func @transform_1(%arg0: i32, %arg1: i32) -> (i32, i32, i32) {
    %c0_i32 = arith.constant 0 : i32
    %c0_i32_0 = arith.constant 0 : i32
    %c0_i32_1 = arith.constant 0 : i32
    return %arg0, %c0_i32, %c0_i32_0 : i32, i32, i32
  }
  func.func @transform_2(%arg0: i32, %arg1: i32) -> (i32, i32, i32) {
    %c0_i32 = arith.constant 0 : i32
    %c0_i32_0 = arith.constant 0 : i32
    %c0_i32_1 = arith.constant 0 : i32
    return %arg0, %c0_i32, %c0_i32_0 : i32, i32, i32
  }
}

module attributes {stable_mosaic.version = 11 : i64} {
  func.func @_apply_kernel(%arg0: i32, %arg1: i32, %arg2: memref<1x4x256xf32, #tpu.memory_space<vmem>>, %arg3: memref<8x4xf32, #tpu.memory_space<vmem>>, %arg4: memref<8x1xf32, #tpu.memory_space<vmem>>, %arg5: memref<1x8x256xf32, #tpu.memory_space<vmem>>) attributes {dimension_semantics = [#tpu.dimension_semantics<parallel>, #tpu.dimension_semantics<parallel>], iteration_bounds = array<i64: 2, 1>, scalar_prefetch = 0 : i64, scratch_operands = 0 : i64, tpu.core_type = #tpu.core_type<tc>, window_params = [{transform_indices = @transform_0, window_bounds = array<i64: 1, 4, 256>}, {pipeline_mode = #tpu.pipeline_mode<synchronous>, transform_indices = @transform_1, window_bounds = array<i64: 8, 4>}, {pipeline_mode = #tpu.pipeline_mode<synchronous>, transform_indices = @transform_2, window_bounds = array<i64: 8, 1>}, {transform_indices = @transform_3, window_bounds = array<i64: 1, 8, 256>}]} {
    %c0 = arith.constant 0 : index
    %c0_0 = arith.constant 0 : index
    %0 = vector.load %arg3[%c0, %c0_0] : memref<8x4xf32, #tpu.memory_space<vmem>>, vector<8x4xf32>
    %c0_1 = arith.constant 0 : index
    %c0_2 = arith.constant 0 : index
    %c0_3 = arith.constant 0 : index
    %1 = vector.load %arg2[%c0_1, %c0_2, %c0_3] : memref<1x4x256xf32, #tpu.memory_space<vmem>>, vector<1x4x256xf32>
    %2 = vector.shape_cast %1 : vector<1x4x256xf32> to vector<4x256xf32>
    %cst = arith.constant dense<0.000000e+00> : vector<8x256xf32>
    %3 = tpu.matmul %0, %2, %cst {dimension_numbers = #tpu.dot_dimension_numbers<[1], [0], [0], [1], [0, 0, 1, 1], [], []>} : vector<8x4xf32>, vector<4x256xf32>, vector<8x256xf32> -> vector<8x256xf32>
    %c0_4 = arith.constant 0 : index
    %c0_5 = arith.constant 0 : index
    %4 = vector.load %arg4[%c0_4, %c0_5] : memref<8x1xf32, #tpu.memory_space<vmem>>, vector<8x1xf32>
    %5 = vector.broadcast %4 : vector<8x1xf32> to vector<8x256xf32>
    %6 = arith.addf %3, %5 : vector<8x256xf32>
    %c0_6 = arith.constant 0 : index
    %c0_7 = arith.constant 0 : index
    %c0_8 = arith.constant 0 : index
    %7 = vector.load %arg5[%c0_6, %c0_7, %c0_8] : memref<1x8x256xf32, #tpu.memory_space<vmem>>, vector<1x8x256xf32>
    %8 = vector.shape_cast %7 : vector<1x8x256xf32> to vector<8x256xf32>
    %9 = vector.shape_cast %6 : vector<8x256xf32> to vector<1x8x256xf32>
    tpu.vector_store %arg5[%c0_6, %c0_7, %c0_8], %9 {strides = array<i32>} : memref<1x8x256xf32, #tpu.memory_space<vmem>>, vector<1x8x256xf32>,
    return
  }
  func.func @transform_0(%arg0: i32, %arg1: i32) -> (i32, i32, i32) {
    %c0_i32 = arith.constant 0 : i32
    %c0_i32_0 = arith.constant 0 : i32
    return %arg0, %c0_i32, %arg1 : i32, i32, i32
  }
  func.func @transform_1(%arg0: i32, %arg1: i32) -> (i32, i32) {
    %c0_i32 = arith.constant 0 : i32
    %c0_i32_0 = arith.constant 0 : i32
    %c0_i32_1 = arith.constant 0 : i32
    return %c0_i32, %c0_i32_0 : i32, i32
  }
  func.func @transform_2(%arg0: i32, %arg1: i32) -> (i32, i32) {
    %c0_i32 = arith.constant 0 : i32
    %c0_i32_0 = arith.constant 0 : i32
    %c0_i32_1 = arith.constant 0 : i32
    return %c0_i32, %c0_i32_0 : i32, i32
  }
  func.func @transform_3(%arg0: i32, %arg1: i32) -> (i32, i32, i32) {
    %c0_i32 = arith.constant 0 : i32
    %c0_i32_0 = arith.constant 0 : i32
    return %arg0, %c0_i32, %arg1 : i32, i32, i32
  }
}

</mosaic_0001>

<bundles_post_ra>
// kernel: mapping_forward.2
= control target key start
LH: loop header
LB: loop body
LE: loop exit
PB: predicated region body
PF: predicated region fallthrough
CT: control target
= control target key end

     0   :  { %s570_s9 = smov 0   ;;  %s572_s10 = smov 0   ;;  %s612_s0 = inlined_call_operand.vmem [shape: f32[2,4,256], index: 0, kind: input, shape index: {}]   ;;  %s613_s1 = inlined_call_operand.vmem [shape: f32[2,4,1], index: 1, kind: output, shape index: {0}]   ;;  %s614_s2 = inlined_call_operand.vmem [shape: f32[2,4,4], index: 2, kind: output, shape index: {1}]  }
   0x1   :  { %s574_s11 = smov 0  }
   0x2 LB: > { %s25_s12 = sadd.s32 1, %s547_s10  ;;  %p443_p0 = scmp.ge.s32.totalorder %s551_s11, 1  ;;  %s551_s11 = sphi %s574_s11, %s13_s11   ;;  %s547_s10 = sphi %s572_s10, %s616_s10   ;;  %s543_s9 = sphi %s570_s9, %s615_s9  }
   0x3   : > { %p27_p1 = scmp.ge.s32.totalorder %s25_s12, 2  ;;  %p134_p2 = scmp.lt.s32.totalorder %s551_s11, 3 }
   0x5   : > { %s618_s12 = smov (%p27_p1, %s25_s12), 0  ;;  %p135_p3 = pnand %p443_p0, %p134_p2 }
   0x6   : > { %p164_p4 = scmp.lt.s32.totalorder (!%p135_p3), %s543_s9, 1  ;;  %v553_v0 = vmov (!%p135_p3), 1.0|1.0   ;;  %vm185_vm0 = vcmask (!%p135_p3), 3072   ;;  %vm187_vm1 = vcmask (!%p135_p3), 27648   ;;  %v554_v3 = vmov (!%p135_p3), 0.0  }
   0x7   : > { %138 = sbr.rel (%p135_p3) target bundleno = 259 (0x103), region = 24  ;;  %486 = vmatprep.subr.bf16.mxu0 (!%p135_p3), %v553_v0 }
   0x8   : > { %487 = vmatpush3.bf16.msra.mxu0 (!%p135_p3), %v553_v0 }
   0x9   : > { %488 = vmatprep.subr.bf16.mxu0 (!%p135_p3), %v553_v0 }
   0xc   : > { %489 = vmatpush3.bf16.msra.mxu0 (!%p135_p3), %v553_v0 }
   0xd   : > { %490 = vmatprep.subr.bf16.mxu0 (!%p135_p3), %v553_v0 }
   0xe   : > { %s620_s9 = smov (!%p164_p4, %s543_s9), 1 }
   0xf   : > { %s450_s13 = sshll.u32 %s620_s9, 3  ;;  %s446_s17 = sshll.u32 %s620_s9, 2 }
  0x10   : > { %s171_s16 = scalar_lea.vmem %s612_s0, %s450_s13  ;;  %491 = vmatpush3.bf16.msra.mxu0 %v553_v0  ;;  %s176_s20 = scalar_lea.vmem %s613_s1, %s446_s17 }
  0x11   : > { %v189_v1 = vld [vmem:[%s171_s16] sm:$0xff]  ;;  %492 = vmatprep.subr.bf16.mxu0 %v553_v0  ;;  %s180_s23 = scalar_lea.vmem %s614_s2, %s446_s17  ;;  %186 = vst.msk [vmem:[%s176_s20] sm:$0xf] %vm185_vm0, %v554_v3 }
  0x12   : > { %v192_v2 = vcombine.high %v189_v1, %v189_v1  ;;  %188 = vst.msk [vmem:[%s180_s23] sm:$0xf] %vm187_vm1, %v554_v3 }
  0x14   : > { %268 = vmatprep.subr.mxu1 %v192_v2  ;;  %258 = vmatprep.mubr.f32.mxu0 %v192_v2 }
  0x15   : > { %269 = vmatpush1.xpose.msra.mxu1 %v189_v1  ;;  %332 = vmatprep.mubr.f32.mxu1 %v192_v2 }
  0x16   : > { %493 = vmatpush3.bf16.msra.mxu0 %v553_v0 }
  0x17   : > { %494 = vmatprep.subr.bf16.mxu0 %v553_v0 }
  0x18   : > { %333 = vmatmul.mubr.f32.vlgmr.msra.gmra.mrb[0].mxu1 %v189_v1  ;;  %v190_v9 = vld [vmem:[%s176_s20] sm:$0xf] }
  0x19   : > { %v267_v4 = vld [vmem:[%s180_s23] sm:$0xf] }
  0x1a   : > { %495 = vmatpush3.bf16.msra.mxu0 %v553_v0 }
  0x1b   : > { %496 = vmatprep.subr.bf16.mxu0 %v553_v0 }
  0x1e   : > { %497 = vmatpush3.bf16.msra.mxu0 %v553_v0 }
  0x1f   : > { %498 = vmatprep.subr.bf16.mxu0 %v553_v0 }
  0x22   : > { %499 = vmatpush3.bf16.msra.mxu0 %v553_v0 }
  0x23   : > { %500 = vmatprep.subr.bf16.mxu0 %v553_v0 }
  0x26   : > { %501 = vmatpush3.bf16.msra.mxu0 %v553_v0 }
  0x29   : > { %259 = vmatmul.mubr.f32.vlgmr.msra.gmra.mrb[0].mxu0 %v189_v1 }
  0xeb   : > { %v334_v5 = vpop.f32.mrb[0].mxu1 }
  0xec   : > { %v338_v6 = vadd.f32 %v334_v5, %v267_v4  ;;  %v336_v7 = vpop.f32.mrb[1].mxu1 }
  0xee   : > { %340 = vst.msk [vmem:[%s180_s23] sm:$0xf] %vm187_vm1, %v338_v6 }
  0xfc   : > { %v483_v8 = vpop.f32.mrb[0].mxu0 }
  0xfd   : > { %v484_v10 = vpop.f32.mrb[1].mxu0 }
  0xfe   : > { %v485_v11 = vadd.f32 %v484_v10, %v483_v8 }
 0x100   : > { %v264_v12 = vadd.f32 %v485_v11, %v190_v9 }
 0x102   : > { %266 = vst.msk [vmem:[%s176_s20] sm:$0xf] %vm185_vm0, %v264_v12 }
 0x103 PF: > { %s13_s11 = sadd.s32 1, %s551_s11   ;;  %s615_s9 = smov %s547_s10 }
 0x104   : > { %p10_p5 = scmp.ge.s32.totalorder %s13_s11, 4   ;;  %s616_s10 = smov %s618_s12 }
 0x106   :  { %12 = sbr.rel (!%p10_p5) target bundleno = 2 (0x2), region = 70 }

// kernel: mapping_forward.3
= control target key start
LH: loop header
LB: loop body
LE: loop exit
PB: predicated region body
PF: predicated region fallthrough
CT: control target
= control target key end

     0   :  { %s479_s12 = smov 0   ;;  %s481_s13 = smov 0   ;;  %s518_s0 = inlined_call_operand.vmem [shape: f32[2,4,256], index: 0, kind: input, shape index: {}]   ;;  %s519_s1 = inlined_call_operand.vmem [shape: f32[8,4], index: 1, kind: input, shape index: {}]   ;;  %s520_s2 = inlined_call_operand.vmem [shape: f32[8,1], index: 2, kind: input, shape index: {}]   ;;  %s521_s3 = inlined_call_operand.vmem [shape: f32[2,8,256], index: 3, kind: output, shape index: {}]  }
   0x1   :  { %s483_s14 = smov 0  }
   0x2 LB: > { %s25_s15 = sadd.s32 1, %s451_s13  ;;  %p393_p0 = scmp.ge.s32.totalorder %s455_s14, 1  ;;  %s455_s14 = sphi %s483_s14, %s13_s14   ;;  %s451_s13 = sphi %s481_s13, %s523_s13   ;;  %s447_s12 = sphi %s479_s12, %s522_s12  }
   0x3   : > { %p27_p1 = scmp.ge.s32.totalorder %s25_s15, 2  ;;  %p158_p2 = scmp.lt.s32.totalorder %s455_s14, 3 }
   0x5   : > { %s525_s15 = smov (%p27_p1, %s25_s15), 0  ;;  %p159_p3 = pnand %p393_p0, %p158_p2 }
   0x6   : > { %p191_p4 = scmp.lt.s32.totalorder (!%p159_p3), %s447_s12, 1  ;;  %v457_v0 = vmov (!%p159_p3), 0.0   ;;  %v458_v1 = vmov (!%p159_p3), 0   ;;  %v212_v2 = vld [vmem:[%s520_s2] sm:$0xff] (!%p159_p3)  ;;  %vm224_vm0 = vcmask (!%p159_p3), 1043456   ;;  %vm220_vm1 = vcmask (!%p159_p3), 31744  }
   0x7   : > { %162 = sbr.rel (%p159_p3) target bundleno = 238 (0xee), region = 32  ;;  %293 = vmatprep.mubr.f32.mxu0 (!%p159_p3), %v457_v0  ;;  %431 = vset.pattern.permute.xlu0 (!%p159_p3), %v458_v1  ;;  %v210_v5 = vld [vmem:[%s519_s1] sm:$0xff] (!%p159_p3) }
   0x8   : > { %215 = vperm.xlu0 (!%p159_p3), %431, %v212_v2  }
   0xe   : > { %s527_s12 = smov (!%p191_p4, %s447_s12), 1 }
   0xf   : > { %s403_s18 = sshll.u32 %s527_s12, 3  ;;  %s404_s24 = sshll.u32 %s527_s12, 4 }
  0x10   : > { %s198_s21 = scalar_lea.vmem %s518_s0, %s403_s18  ;;  %s208_s27 = scalar_lea.vmem %s521_s3, %s404_s24 }
  0x11   : > { %v211_v3 = vld [vmem:[%s198_s21] sm:$0xff] }
  0x12   : > { %v219_v4 = vcombine.high %v211_v3, %v211_v3 }
  0x14   : > { %398 = vmatprep.subr.msk.mxu0 %vm224_vm0, %v219_v4 }
  0x15   : > { %399 = vmatpush1.msk.msra.mxu0 %vm224_vm0, %v211_v3 }
  0x16   : > { %400 = vmatmul.mubr.msk.f32.vlgmr.msra.gmra.mrb[0].mxu0 %vm220_vm1, %v210_v5 }
  0x87   : > { %v216_v6 = vpop.permute.xlu0 %215 }
  0xe9   : > { %v295_v7 = vpop.f32.mrb[0].mxu0 }
  0xea   : > { %v296_v8 = vadd.f32 %v295_v7, %v216_v6  ;;  %v297_v9 = vpop.f32.mrb[1].mxu0 }
  0xeb   : > { %v298_v10 = vadd.f32 %v297_v9, %v216_v6 }
  0xec   : > { %300 = vst [vmem:[%s208_s27] sm:$0xff] %v296_v8 }
  0xed   : > { %301 = vst [vmem:[%s208_s27 + $0x8] sm:$0xff] %v298_v10 }
  0xee PF: > { %s13_s14 = sadd.s32 1, %s455_s14   ;;  %s522_s12 = smov %s451_s13 }
  0xef   : > { %p10_p5 = scmp.ge.s32.totalorder %s13_s14, 4   ;;  %s523_s13 = smov %s525_s15 }
  0xf1   :  { %12 = sbr.rel (!%p10_p5) target bundleno = 2 (0x2), region = 62 }

</bundles_post_ra>
